<compile_context>
chip_gen: v7x
topology: tpu7x:2x2x1
jax: 0.10.0
libtpu: 0.0.40
codegen_flags: <defaults>
</compile_context>

<pallas_src>
import jax
import jax.numpy as jnp
from jax.experimental import pallas as pl
from jax.experimental.pallas import tpu as pltpu


def _pooling_kernel(tok_ref, mask_ref, out_ref,
                    cls_acc, max_acc, sum_acc, cnt_acc):
    # tok_ref:  (bB, bS, D)  native dtype
    # mask_ref: (bB, bS)     token dtype (0./1.)
    # out_ref:  (bB, 4*D)    float32, lanes [cls | max | mean | mean_sqrt]
    s = pl.program_id(1)
    D = tok_ref.shape[-1]

    tok = tok_ref[...]                                   # (bB, bS, D) native
    mask = mask_ref[...]                                 # (bB, bS)
    mask3 = mask[:, :, None]                             # (bB, bS, 1)

    # torch: token_embeddings[mask == 0] = -1e9 (in place; feeds cls and max).
    # Keep in the input dtype (halves VPU work for bf16 on v6e/v7x).
    neg_fill = jnp.asarray(-1e9, dtype=tok.dtype)
    masked = jnp.where(mask3 == 0, neg_fill, tok)        # (bB, bS, D) native

    blk_max = jnp.max(masked, axis=1)                    # (bB, D) native

    # Masked sum over tokens on the MXU (otherwise idle), f32 accumulation.
    blk_sum = jnp.einsum(
        "bks,bsd->bkd", mask[:, None, :], tok,
        preferred_element_type=jnp.float32)[:, 0, :]     # (bB, D) f32

    blk_cnt = jnp.sum(mask.astype(jnp.float32), axis=1, keepdims=True)  # (bB,1)

    @pl.when(s == 0)
    def _init():
        cls_acc[...] = masked[:, 0, :]                   # global token 0 is in s-block 0
        max_acc[...] = blk_max
        sum_acc[...] = blk_sum
        cnt_acc[...] = blk_cnt

    @pl.when(s > 0)
    def _accumulate():
        max_acc[...] = jnp.maximum(max_acc[...], blk_max)
        sum_acc[...] = sum_acc[...] + blk_sum
        cnt_acc[...] = cnt_acc[...] + blk_cnt

    @pl.when(s == pl.num_programs(1) - 1)
    def _finalize():
        cnt = jnp.maximum(cnt_acc[...], jnp.float32(1e-9))   # clamp(min=1e-9)
        se = sum_acc[...]
        odt = out_ref.dtype
        # Four static, lane-dense D-wide stores (no sublane-4 relayout).
        out_ref[:, 0:D] = cls_acc[...].astype(odt)
        out_ref[:, D:2 * D] = max_acc[...].astype(odt)
        out_ref[:, 2 * D:3 * D] = (se / cnt).astype(odt)
        out_ref[:, 3 * D:4 * D] = (se / jnp.sqrt(cnt)).astype(odt)


def _vmem_plan():
    """(per-block byte budget, vmem_limit_bytes), generation aware."""
    try:
        cap = int(pltpu.get_tpu_info().vmem_capacity_bytes)
    except Exception:
        cap = 64 * 1024 * 1024  # conservative: assume v7x-sized VMEM
    if cap >= 96 * 1024 * 1024:                 # v5e / v6e: 128 MiB physical
        return 12 * 1024 * 1024, 96 * 1024 * 1024
    return 5 * 1024 * 1024, 44 * 1024 * 1024    # v7x: 64 MiB per TensorCore


def _choose_batch_block(B: int, per_row_bytes: int, min_rows: int,
                        budget: int) -> int:
    """bB must be a multiple of 8 (or == B): it sits on the sublane axis of
    the 2D mask / output blocks.  Keep >= 2 batch tiles when possible so the
    'parallel' batch axis can shard across TensorCores (v7x megacore)."""
    if B <= 8 or B % 8 != 0:
        return B
    best = 8
    for cand in range(8, min(B // 2, 64) + 1, 8):
        if B % cand == 0 and cand * per_row_bytes * min_rows <= budget:
            best = cand
    return best


def _choose_seq_block(S: int, row_bytes: int, budget: int):
    """Returns (bS, S_pad).  Full extent if it fits; otherwise a multiple of
    128 (satisfies the token sublane pack for all dtypes AND the 2D mask's
    lane constraint).  If no multiple of 128 divides S, S is padded."""
    if S * row_bytes <= budget:
        return S, S
    max_bs = max(128, (budget // row_bytes) // 128 * 128)
    for cand in range(max_bs, 0, -128):
        if S % cand == 0:
            return cand, S
    bs = max_bs
    s_pad = ((S + bs - 1) // bs) * bs
    return bs, s_pad


def transformer_pooling(token_embeddings: jax.Array,
                        attention_mask: jax.Array) -> jax.Array:
    """Returns the (B, 4*D) sequence embedding = concat[cls, max, mean, mean_sqrt]."""
    B, S, D = token_embeddings.shape
    assert attention_mask.shape == (B, S)

    tok_dtype = token_embeddings.dtype
    itemsize = jnp.dtype(tok_dtype).itemsize
    budget, vmem_limit = _vmem_plan()

    bB = _choose_batch_block(B, D * itemsize, min(S, 128), budget)
    bS, S_pad = _choose_seq_block(S, bB * D * itemsize, budget)

    # Mask is 2D and in the token dtype (lane-dense along S, MXU-ready).
    mask2 = attention_mask.astype(tok_dtype)
    tok = token_embeddings
    if S_pad != S:
        tok = jnp.pad(tok, ((0, 0), (0, S_pad - S), (0, 0)))
        mask2 = jnp.pad(mask2, ((0, 0), (0, S_pad - S)))   # pad rows inert (mask 0)

    grid = (B // bB, S_pad // bS)

    cost = pl.CostEstimate(
        flops=5 * B * S_pad * D,
        transcendentals=2 * B,
        bytes_accessed=B * S_pad * D * itemsize + B * S_pad * itemsize + B * 4 * D * 4,
    )

    out = pl.pallas_call(
        _pooling_kernel,
        out_shape=jax.ShapeDtypeStruct((B, 4 * D), jnp.float32),
        grid=grid,
        in_specs=[
            pl.BlockSpec((bB, bS, D), lambda b, s: (b, s, 0)),
            pl.BlockSpec((bB, bS), lambda b, s: (b, s)),
        ],
        out_specs=pl.BlockSpec((bB, 4 * D), lambda b, s: (b, 0)),
        scratch_shapes=[
            pltpu.VMEM((bB, D), tok_dtype),      # cls (input dtype)
            pltpu.VMEM((bB, D), tok_dtype),      # running max (input dtype)
            pltpu.VMEM((bB, D), jnp.float32),    # running masked sum
            pltpu.VMEM((bB, 1), jnp.float32),    # running mask count
        ],
        compiler_params=pltpu.CompilerParams(
            dimension_semantics=("parallel", "arbitrary"),
            vmem_limit_bytes=vmem_limit,
        ),
        cost_estimate=cost,
    )(tok, mask2)

    return out  # already (B, 4*D): [cls | max | mean | mean_sqrt]


def _reference(token_embeddings, attention_mask):
    tok = token_embeddings.astype(jnp.float32)
    mask = attention_mask.astype(jnp.float32)[:, :, None]
    masked = jnp.where(mask == 0.0, -1e9, tok)
    cls = masked[:, 0, :]
    mx = jnp.max(masked, axis=1)
    s = jnp.sum(tok * mask, axis=1)
    sm = jnp.maximum(jnp.sum(mask, axis=1), 1e-9)
    return jnp.concatenate([cls, mx, s / sm, s / jnp.sqrt(sm)], axis=1)


if __name__ == "__main__":
    B, S, D = 2, 8, 32  # batch=2, seq=8, hidden=32

    key = jax.random.PRNGKey(0)
    k_tok, _ = jax.random.split(key)
    token_embeddings = jax.random.normal(k_tok, (B, S, D), dtype=jnp.float32)
    # deterministic mask: first rows valid, tails padded
    lengths = jnp.array([5, 8], dtype=jnp.int32)
    attention_mask = (jnp.arange(S)[None, :] < lengths[:, None]).astype(jnp.int32)

    out = transformer_pooling(token_embeddings, attention_mask)
    out = jax.block_until_ready(out)

    ref = _reference(token_embeddings, attention_mask)
    assert out.shape == (B, 4 * D), out.shape
    assert jnp.allclose(out, ref, atol=1e-5, rtol=1e-5), "mismatch vs reference"

    print("KERNEL_OK")
</pallas_src>

<mosaic_0001>
module attributes {stable_mosaic.version = 11 : i64} {
  func.func @_pooling_kernel(%arg0: i32, %arg1: i32, %arg2: memref<2x8x32xf32, #tpu.memory_space<vmem>>, %arg3: memref<2x8xf32, #tpu.memory_space<vmem>>, %arg4: memref<2x128xf32, #tpu.memory_space<vmem>>, %arg5: memref<2x32xf32, #tpu.memory_space<vmem>>, %arg6: memref<2x32xf32, #tpu.memory_space<vmem>>, %arg7: memref<2x32xf32, #tpu.memory_space<vmem>>, %arg8: memref<2x1xf32, #tpu.memory_space<vmem>>) attributes {dimension_semantics = [#tpu.dimension_semantics<parallel>, #tpu.dimension_semantics<arbitrary>], iteration_bounds = array<i64: 1, 1>, scalar_prefetch = 0 : i64, scratch_operands = 4 : i64, tpu.core_type = #tpu.core_type<tc>, window_params = [{transform_indices = @transform_0, window_bounds = array<i64: 2, 8, 32>}, {transform_indices = @transform_1, window_bounds = array<i64: 2, 8>}, {transform_indices = @transform_2, window_bounds = array<i64: 2, 128>}]} {
    %c0 = arith.constant 0 : index
    %c0_0 = arith.constant 0 : index
    %c0_1 = arith.constant 0 : index
    %0 = vector.load %arg2[%c0, %c0_0, %c0_1] : memref<2x8x32xf32, #tpu.memory_space<vmem>>, vector<2x8x32xf32>
    %c0_2 = arith.constant 0 : index
    %c0_3 = arith.constant 0 : index
    %1 = vector.load %arg3[%c0_2, %c0_3] : memref<2x8xf32, #tpu.memory_space<vmem>>, vector<2x8xf32>
    %2 = vector.shape_cast %1 : vector<2x8xf32> to vector<2x8x1xf32>
    %cst = arith.constant 0.000000e+00 : f32
    %3 = vector.broadcast %cst : f32 to vector<2x8x1xf32>
    %4 = arith.cmpf oeq, %2, %3 : vector<2x8x1xf32>
    %cst_4 = arith.constant -1.000000e+09 : f32
    %5 = vector.shape_cast %4 : vector<2x8x1xi1> to vector<2x8x1xi1>
    %6 = vector.broadcast %5 : vector<2x8x1xi1> to vector<2x8x32xi1>
    %7 = vector.broadcast %cst_4 : f32 to vector<2x8x32xf32>
    %8 = arith.select %6, %7, %0 : vector<2x8x32xi1>, vector<2x8x32xf32>
    %cst_5 = arith.constant dense<0xFF800000> : vector<2x32xf32>
    %9 = vector.multi_reduction <maximumf>, %8, %cst_5 [1] : vector<2x8x32xf32> to vector<2x32xf32>
    %10 = vector.shape_cast %1 : vector<2x8xf32> to vector<2x1x8xf32>
    "tpu.trace_start"() <{level = 10 : i32, message = "bks,bsd->bkd"}> : () -> ()
    %cst_6 = arith.constant dense<0.000000e+00> : vector<2x1x32xf32>
    %11 = tpu.matmul %10, %0, %cst_6 {dimension_numbers = #tpu.dot_dimension_numbers<[2], [1], [1], [2], [0, 0, 0, 1, 1, 2], [0], [0]>} : vector<2x1x8xf32>, vector<2x8x32xf32>, vector<2x1x32xf32> -> vector<2x1x32xf32>
    "tpu.trace_stop"() : () -> ()
    %12 = vector.shape_cast %11 : vector<2x1x32xf32> to vector<2x32xf32>
    %cst_7 = arith.constant dense<0.000000e+00> : vector<2xf32>
    %13 = vector.multi_reduction <add>, %1, %cst_7 [1] : vector<2x8xf32> to vector<2xf32>
    %14 = vector.shape_cast %13 : vector<2xf32> to vector<2x1xf32>
    %c0_i32 = arith.constant 0 : i32
    %15 = arith.cmpi eq, %arg1, %c0_i32 : i32
    %16 = arith.extui %15 : i1 to i32
    %c0_i32_8 = arith.constant 0 : i32
    %17 = arith.cmpi ne, %16, %c0_i32_8 : i32
    scf.if %17 {
      %24 = vector.extract_strided_slice %8 {offsets = [0, 0, 0], sizes = [2, 1, 32], strides = [1, 1, 1]} : vector<2x8x32xf32> to vector<2x1x32xf32>
      %25 = vector.shape_cast %24 : vector<2x1x32xf32> to vector<2x32xf32>
      %c0_13 = arith.constant 0 : index
      %c0_14 = arith.constant 0 : index
      %26 = vector.load %arg5[%c0_13, %c0_14] : memref<2x32xf32, #tpu.memory_space<vmem>>, vector<2x32xf32>
      tpu.vector_store %arg5[%c0_13, %c0_14], %25 {strides = array<i32>} : memref<2x32xf32, #tpu.memory_space<vmem>>, vector<2x32xf32>,
      %c0_15 = arith.constant 0 : index
      %c0_16 = arith.constant 0 : index
      %27 = vector.load %arg6[%c0_15, %c0_16] : memref<2x32xf32, #tpu.memory_space<vmem>>, vector<2x32xf32>
      tpu.vector_store %arg6[%c0_15, %c0_16], %9 {strides = array<i32>} : memref<2x32xf32, #tpu.memory_space<vmem>>, vector<2x32xf32>,
      %c0_17 = arith.constant 0 : index
      %c0_18 = arith.constant 0 : index
      %28 = vector.load %arg7[%c0_17, %c0_18] : memref<2x32xf32, #tpu.memory_space<vmem>>, vector<2x32xf32>
      tpu.vector_store %arg7[%c0_17, %c0_18], %12 {strides = array<i32>} : memref<2x32xf32, #tpu.memory_space<vmem>>, vector<2x32xf32>,
      %c0_19 = arith.constant 0 : index
      %c0_20 = arith.constant 0 : index
      %29 = vector.load %arg8[%c0_19, %c0_20] : memref<2x1xf32, #tpu.memory_space<vmem>>, vector<2x1xf32>
      tpu.vector_store %arg8[%c0_19, %c0_20], %14 {strides = array<i32>} : memref<2x1xf32, #tpu.memory_space<vmem>>, vector<2x1xf32>,
    } else {
    }
    %c0_i32_9 = arith.constant 0 : i32
    %18 = arith.cmpi sgt, %arg1, %c0_i32_9 : i32
    %19 = arith.extui %18 : i1 to i32
    %c0_i32_10 = arith.constant 0 : i32
    %20 = arith.cmpi ne, %19, %c0_i32_10 : i32
    scf.if %20 {
      %c0_13 = arith.constant 0 : index
      %c0_14 = arith.constant 0 : index
      %24 = vector.load %arg6[%c0_13, %c0_14] : memref<2x32xf32, #tpu.memory_space<vmem>>, vector<2x32xf32>
      %25 = arith.maximumf %24, %9 : vector<2x32xf32>
      %c0_15 = arith.constant 0 : index
      %c0_16 = arith.constant 0 : index
      %26 = vector.load %arg6[%c0_15, %c0_16] : memref<2x32xf32, #tpu.memory_space<vmem>>, vector<2x32xf32>
      tpu.vector_store %arg6[%c0_15, %c0_16], %25 {strides = array<i32>} : memref<2x32xf32, #tpu.memory_space<vmem>>, vector<2x32xf32>,
      %c0_17 = arith.constant 0 : index
      %c0_18 = arith.constant 0 : index
      %27 = vector.load %arg7[%c0_17, %c0_18] : memref<2x32xf32, #tpu.memory_space<vmem>>, vector<2x32xf32>
      %28 = arith.addf %27, %12 : vector<2x32xf32>
      %c0_19 = arith.constant 0 : index
      %c0_20 = arith.constant 0 : index
      %29 = vector.load %arg7[%c0_19, %c0_20] : memref<2x32xf32, #tpu.memory_space<vmem>>, vector<2x32xf32>
      tpu.vector_store %arg7[%c0_19, %c0_20], %28 {strides = array<i32>} : memref<2x32xf32, #tpu.memory_space<vmem>>, vector<2x32xf32>,
      %c0_21 = arith.constant 0 : index
      %c0_22 = arith.constant 0 : index
      %30 = vector.load %arg8[%c0_21, %c0_22] : memref<2x1xf32, #tpu.memory_space<vmem>>, vector<2x1xf32>
      %31 = arith.addf %30, %14 : vector<2x1xf32>
      %c0_23 = arith.constant 0 : index
      %c0_24 = arith.constant 0 : index
      %32 = vector.load %arg8[%c0_23, %c0_24] : memref<2x1xf32, #tpu.memory_space<vmem>>, vector<2x1xf32>
      tpu.vector_store %arg8[%c0_23, %c0_24], %31 {strides = array<i32>} : memref<2x1xf32, #tpu.memory_space<vmem>>, vector<2x1xf32>,
    } else {
    }
    %c0_i32_11 = arith.constant 0 : i32
    %21 = arith.cmpi eq, %arg1, %c0_i32_11 : i32
    %22 = arith.extui %21 : i1 to i32
    %c0_i32_12 = arith.constant 0 : i32
    %23 = arith.cmpi ne, %22, %c0_i32_12 : i32
    scf.if %23 {
      %c0_13 = arith.constant 0 : index
      %c0_14 = arith.constant 0 : index
      %24 = vector.load %arg8[%c0_13, %c0_14] : memref<2x1xf32, #tpu.memory_space<vmem>>, vector<2x1xf32>
      %cst_15 = arith.constant 9.99999971E-10 : f32
      %25 = vector.broadcast %cst_15 : f32 to vector<2x1xf32>
      %26 = arith.maximumf %24, %25 : vector<2x1xf32>
      %c0_16 = arith.constant 0 : index
      %c0_17 = arith.constant 0 : index
      %27 = vector.load %arg7[%c0_16, %c0_17] : memref<2x32xf32, #tpu.memory_space<vmem>>, vector<2x32xf32>
      %c0_18 = arith.constant 0 : index
      %c0_19 = arith.constant 0 : index
      %28 = vector.load %arg5[%c0_18, %c0_19] : memref<2x32xf32, #tpu.memory_space<vmem>>, vector<2x32xf32>
      %c0_20 = arith.constant 0 : index
      %c0_21 = arith.constant 0 : index
      %29 = vector.load %arg4[%c0_20, %c0_21] : memref<2x128xf32, #tpu.memory_space<vmem>>, vector<2x32xf32>
      tpu.vector_store %arg4[%c0_20, %c0_21], %28 {strides = array<i32>} : memref<2x128xf32, #tpu.memory_space<vmem>>, vector<2x32xf32>,
      %c0_22 = arith.constant 0 : index
      %c0_23 = arith.constant 0 : index
      %30 = vector.load %arg6[%c0_22, %c0_23] : memref<2x32xf32, #tpu.memory_space<vmem>>, vector<2x32xf32>
      %c0_24 = arith.constant 0 : index
      %c32 = arith.constant 32 : index
      %31 = vector.load %arg4[%c0_24, %c32] : memref<2x128xf32, #tpu.memory_space<vmem>>, vector<2x32xf32>
      tpu.vector_store %arg4[%c0_24, %c32], %30 {strides = array<i32>} : memref<2x128xf32, #tpu.memory_space<vmem>>, vector<2x32xf32>,
      %32 = vector.broadcast %26 : vector<2x1xf32> to vector<2x32xf32>
      %33 = arith.divf %27, %32 : vector<2x32xf32>
      %c0_25 = arith.constant 0 : index
      %c64 = arith.constant 64 : index
      %34 = vector.load %arg4[%c0_25, %c64] : memref<2x128xf32, #tpu.memory_space<vmem>>, vector<2x32xf32>
      tpu.vector_store %arg4[%c0_25, %c64], %33 {strides = array<i32>} : memref<2x128xf32, #tpu.memory_space<vmem>>, vector<2x32xf32>,
      %35 = math.sqrt %26 : vector<2x1xf32>
      %36 = vector.broadcast %35 : vector<2x1xf32> to vector<2x32xf32>
      %37 = arith.divf %27, %36 : vector<2x32xf32>
      %c0_26 = arith.constant 0 : index
      %c96 = arith.constant 96 : index
      %38 = vector.load %arg4[%c0_26, %c96] : memref<2x128xf32, #tpu.memory_space<vmem>>, vector<2x32xf32>
      tpu.vector_store %arg4[%c0_26, %c96], %37 {strides = array<i32>} : memref<2x128xf32, #tpu.memory_space<vmem>>, vector<2x32xf32>,
    } else {
    }
    return
  }
  func.func @transform_0(%arg0: i32, %arg1: i32) -> (i32, i32, i32) {
    %c0_i32 = arith.constant 0 : i32
    %c0_i32_0 = arith.constant 0 : i32
    return %arg0, %arg1, %c0_i32 : i32, i32, i32
  }
  func.func @transform_1(%arg0: i32, %arg1: i32) -> (i32, i32) {
    %c0_i32 = arith.constant 0 : i32
    return %arg0, %arg1 : i32, i32
  }
  func.func @transform_2(%arg0: i32, %arg1: i32) -> (i32, i32) {
    %c0_i32 = arith.constant 0 : i32
    %c0_i32_0 = arith.constant 0 : i32
    return %arg0, %c0_i32 : i32, i32
  }
}

</mosaic_0001>

<bundles_post_ra>
// kernel: tpu_custom_call.1
= control target key start
LH: loop header
LB: loop body
LE: loop exit
PB: predicated region body
PF: predicated region fallthrough
CT: control target
= control target key end

     0   :  { %7 = vsyncpa [#allocation7], 0  ;;  %s497_s0 = inlined_call_operand.hbm [shape: f32[2,8,32], index: 0, kind: input, shape index: {}]   ;;  %s498_s1 = inlined_call_operand.vmem [shape: f32[2,8], index: 1, kind: input, shape index: {}]   ;;  %s499_s2 = inlined_call_operand.hbm [shape: f32[2,128], index: 2, kind: output, shape index: {}]  }
   0x1   :  { %8 = vsyncpa [#allocation8], 0  ;;  %s435_s9 = smov [#allocation6]   ;;  %s387_s13 = scalar_lea.hbm %s497_s0, 256 }
   0x2   :  { %s14_s10 = sshll.u32 %s435_s9, 4  ;;  %p388_p0 = scmp.ne.s32.totalorder %s497_s0, %s387_s13  ;;  %s15_s10 = int_to_ptr.vmem [resolvable:$true] %s14_s10 }
   0x3   :  { %p391_p1 = scmp.lt.u32.totalorder %s387_s13, %s497_s0 }
   0x5   :  { %p393_p2 = pnand %p391_p1, %p388_p0 }
   0x7   :  { %396 = shalt.err (!%p393_p2)
}
   0x8   :  { %s397_s18 = scalar_lea.vmem %s15_s10, 256  ;;  %p402_p4 = scmp.lt.s32.totalorder %s15_s10, %s15_s10 }
   0x9   :  { %p398_p3 = scmp.ne.s32.totalorder %s15_s10, %s397_s18  ;;  %p403_p5 = scmp.lt.s32.totalorder %s397_s18, %s397_s18 }
   0xb   :  { %p404_p6 = por %p403_p5, %p402_p4 }
   0xd   :  { %p405_p7 = pnand %p404_p6, %p398_p3 }
   0xf   :  { %408 = shalt.err (!%p405_p7)
}
  0x10   :  { %s436_s19 = smov 128   ;;  %s437_s20 = smov 8  }
  0x11   :  { %20 = dma.hbm_to_vmem [thread:$0]  %s497_s0, 256, %s15_s10, [#allocation7], %s436_s19, %s436_s19, %s437_s20  }
  0x12   :  { %431 = dma.done.wait [#allocation7], 256  }
  0x13   :  { %432 = vsyncadd [#allocation7], 4294967040  ;;  %v29_v0 = vlaneseq  ;;  %v438_v1 = vmov 1966171168   ;;  %v439_v3 = vmov 0.0   ;;  %vm440_vm0 = vmmov 0  }
  0x14   :  { %v68_v2 = vunpack.c.l.s4 %v438_v1  ;;  %363 = vmatprep.subr.mxu1 %v439_v3  ;;  %358 = vmatprep.subr.mxu0 %v439_v3  ;;  %vm234_vm1 = vcmask 58368   ;;  %v28_v7 = vld [vmem:[%s498_s1] sm:$0x3]  ;;  %v27_v8 = vld [vmem:[#allocation6 + $0x8] sm:$0xff]  ;;  %v26_v9 = vld [vmem:[#allocation6] sm:$0xff]  ;;  %vm89_vm2 = vcmask 64512  }
  0x15   :  { %v30_v4 = vshrl.u32 %v29_v0, 7  ;;  %365 = vmatprep.mubr.msk.f32.mxu1 %vm440_vm0, %v439_v3  ;;  %360 = vmatprep.mubr.msk.f32.mxu0 %vm440_vm0, %v439_v3  ;;  %v235_v10 = vsel %vm234_vm1, %v28_v7, 0.0  ;;  %v441_v17 = vmov 0   ;;  %vm51_vm3 = vcmask 261120   ;;  %s442_s0 = smov 32   ;;  %s443_s1 = smov 64  }
  0x16   :  { %v69_v5 = vunpack.c.0.s8 %v68_v2  ;;  %364 = vmatpush3.msra.mxu1 %v27_v8  ;;  %359 = vmatpush3.msra.mxu0 %v26_v9  ;;  %vm261_vm5 = vcmask 1024   ;;  %vm245_vm6 = vcmask 1041409   ;;  %vm248_vm7 = vcmask 254976   ;;  %s444_s25 = smov 96   ;;  %s445_s26 = smov [#allocation9]  }
  0x17   :  { %236 = vadd.xlane.f32.xlu0 %v235_v10  ;;  %v38_v15 = vsub.s32 1, %v30_v4  ;;  %v31_v16 = vsub.s32 0, %v30_v4  ;;  %379 = vset.pattern.permute.xlu1 %v441_v17  ;;  %vm302_vm11 = vcmask 517376   ;;  %vm315_vm12 = vcmask 779776   ;;  %s343_s27 = sshll.u32 %s445_s26, 4  ;;  %s344_s27 = int_to_ptr.vmem [resolvable:$true] %s343_s27 }
  0x18   :  { %v72_v6 = vsub.s32 %v69_v5, %v30_v4  ;;  %380 = vset.pattern.permute.xlu0 %v441_v17  ;;  %vm335_vm13 = vcmask 1042176   ;;  %s409_s28 = scalar_lea.vmem %s344_s27, 32  ;;  %p414_p9 = scmp.lt.s32.totalorder %s344_s27, %s344_s27 }
  0x19   :  { %v39_v18 = vrot.slane %v28_v7, %v38_v15  ;;  %v32_v19 = vrot.slane %v28_v7, %v31_v16  ;;  %p410_p8 = scmp.ne.s32.totalorder %s344_s27, %s409_s28  ;;  %p415_p10 = scmp.lt.s32.totalorder %s409_s28, %s409_s28 }
  0x1a   :  { %v73_v11 = vrot.slane %v28_v7, %v72_v6 }
  0x1b   :  { %41 = vbcast.lane.b32.xlu1 %v39_v18, 256  ;;  %p416_p11 = por %p415_p10, %p414_p9 }
  0x1c   :  { %v74_v12 = vcombine.high %v73_v11, %v73_v11  ;;  %v81_v13 = vrot.slane %v73_v11, %v72_v6 }
  0x1d   :  { %p417_p12 = pnand %p416_p11, %p410_p8 }
  0x1e   :  { %v88_v14 = vrot.slane %v74_v12, %v72_v6  ;;  %361 = vmatmul.mubr.msk.f32.vlgmr.msra.gmra.mrb[0].mxu0 %vm89_vm2, %v81_v13 }
  0x20   :  { %366 = vmatmul.mubr.msk.f32.vlgmr.msra.gmra.mrb[0].mxu1 %vm89_vm2, %v88_v14 }
  0x2d   :  { %34 = vbcast.lane.b32.xlu0 %v32_v19, 256 }
  0x8d   :  { %v42_v20 = vpop.permute.xlu1 %41 }
  0x8e   :  { %vm44_vm4 = vcmp.eq.f32.partialorder %v42_v20, 0.0 }
  0x8f   :  { %v50_v21 = vsel %vm44_vm4, -1e+09, %v27_v8 }
  0x90   :  { %v59_v22 = vsel %vm51_vm3, %v50_v21, -inf  ;;  %v244_v26 = vrot.slane %v50_v21, 7 }
  0x91   :  { %v60_v23 = vrot.slane %v59_v22, 4 }
  0x93   :  { %v61_v25 = vmax.f32 %v59_v22, %v60_v23 }
  0x95   :  { %v62_v27 = vrot.slane %v61_v25, 2 }
  0x97   :  { %v63_v33 = vmax.f32 %v61_v25, %v62_v27 }
  0x99   :  { %v64_v37 = vrot.slane %v63_v33, 1 }
  0x9b   :  { %v65_v40 = vmax.f32 %v63_v33, %v64_v37 }
  0xa4   :  { %v237_v24 = vpop.xlane.xlu0 %236 }
  0xa5   :  { %262 = vst.msk [vmem:[#allocation5] sm:$0x3] %vm261_vm5, %v237_v24 }
  0xa8   :  { %v35_v28 = vpop.permute.xlu0 %34 }
  0xa9   :  { %vm43_vm8 = vcmp.eq.f32.partialorder %v35_v28, 0.0 }
  0xaa   :  { %v49_v29 = vsel %vm43_vm8, -1e+09, %v26_v9 }
  0xab   :  { %v52_v30 = vsel %vm51_vm3, %v49_v29, -inf  ;;  %v246_v31 = vsel %vm245_vm6, %v244_v26, %v49_v29 }
  0xac   :  { %v291_v32 = vld [vmem:[#allocation5] sm:$0x3]  ;;  %v53_v34 = vrot.slane %v52_v30, 4  ;;  %249 = vst.msk [vmem:[#allocation2] sm:$0x3] %vm248_vm7, %v246_v31 }
  0xad   :  { %v292_v35 = vmax.f32 %v291_v32, 1e-09 }
  0xae   :  { %v54_v36 = vmax.f32 %v52_v30, %v53_v34 }
  0xaf   :  { %306 = vperm.xlu1 %379, %v292_v35   ;;  %381 = vrsqrt.f32 %v292_v35  ;;  %vm319_vm9 = vcmp.eq.f32.partialorder %v292_v35, inf  ;;  %v322_v47 = vand.u32 2147483648, %v292_v35  ;;  %vm321_vm10 = vcmp.eq.f32.partialorder %v292_v35, 0.0 }
  0xb0   :  { %v55_v38 = vrot.slane %v54_v36, 2 }
  0xb2   :  { %v56_v39 = vmax.f32 %v54_v36, %v55_v38 }
  0xb3   :  { %v294_v42 = vld [vmem:[#allocation2] sm:$0x3] }
  0xb4   :  { %v57_v41 = vrot.slane %v56_v39, 1  ;;  %296 = vst.msk [vmem:[#allocation9] sm:$0x3] %vm248_vm7, %v294_v42 }
  0xb6   :  { %v58_v43 = vmax.f32 %v56_v39, %v57_v41 }
  0xb8   :  { %v252_v44 = vsel %vm245_vm6, %v65_v40, %v58_v43 }
  0xb9   :  { %v382_v45 = vpop.eup %381  ;;  %254 = vst.msk [vmem:[#allocation3] sm:$0x3] %vm248_vm7, %v252_v44 }
  0xba   :  { %v318_v46 = vmul.f32 %v382_v45, %v292_v35 }
  0xbc   :  { %v320_v48 = vsel %vm319_vm9, %v292_v35, %v318_v46 }
  0xbd   :  { %v323_v49 = vsel %vm321_vm10, %v322_v47, %v320_v48 }
  0xbe   :  { %326 = vperm.xlu1 %379, %v323_v49  }
  0xc0   :  { %v297_v50 = vld [vmem:[#allocation3] sm:$0x3] }
  0xc2   :  { %299 = vrot.lane.b32.xlu1 %v297_v50, %s442_s0 }
  0xf1   :  { %v158_v51 = vpop.f32.mrb[0].mxu0 }
  0xf2   :  { %v362_v52 = vpop.f32.mrb[1].mxu0 }
  0xf3   :  { %v230_v53 = vpop.f32.mrb[0].mxu1 }
  0xf4   :  { %v257_v54 = vrot.slane %v230_v53, 7  ;;  %v367_v55 = vpop.f32.mrb[1].mxu1 }
  0xf6   :  { %v258_v56 = vsel %vm245_vm6, %v257_v54, %v158_v51 }
  0xf7   :  { %260 = vst.msk [vmem:[#allocation4] sm:$0x3] %vm248_vm7, %v258_v56 }
  0xfe   :  { %v293_v58 = vld [vmem:[#allocation4] sm:$0x3] }
 0x12e   :  { %v307_v57 = vpop.permute.xlu1 %306 }
 0x12f   :  { %383 = vrcp.f32 %v307_v57 }
 0x139   :  { %v384_v59 = vpop.eup %383 }
 0x13a   :  { %v310_v60 = vmul.f32 %v384_v59, %v293_v58 }
 0x13c   :  { %312 = vrot.lane.b32.xlu1 %v310_v60, %s443_s1 }
 0x13d   :  { %v327_v61 = vpop.permute.xlu1 %326 }
 0x13e   :  { %385 = vrcp.f32 %v327_v61 }
 0x141   :  { %v300_v62 = vpop.permute.xlu1 %299 }
 0x142   :  { %303 = vst.msk [vmem:[#allocation9] sm:$0x3] %vm302_vm11, %v300_v62 }
 0x148   :  { %v386_v63 = vpop.eup %385 }
 0x149   :  { %v330_v0 = vmul.f32 %v386_v63, %v293_v58 }
 0x14b   :  { %332 = vrot.lane.b32.xlu1 %v330_v0, %s444_s25 }
 0x1ae   :  { %v313_v1 = vpop.permute.xlu1 %312 }
 0x1af   :  { %316 = vst.msk [vmem:[#allocation9] sm:$0x3] %vm315_vm12, %v313_v1 }
 0x1bd   :  { %v333_v2 = vpop.permute.xlu1 %332 }
 0x1be   :  { %336 = vst.msk [vmem:[#allocation9] sm:$0x3] %vm335_vm13, %v333_v2 }
 0x1bf   :  { %420 = shalt.err (!%p417_p12)
}
 0x1c0   :  { %s421_s3 = scalar_lea.hbm %s499_s2, 32 }
 0x1c1   :  { %p422_p13 = scmp.ne.s32.totalorder %s499_s2, %s421_s3  ;;  %p425_p0 = scmp.lt.u32.totalorder %s421_s3, %s499_s2 }
 0x1c3   :  { %p427_p1 = pnand %p425_p0, %p422_p13 }
 0x1c5   :  { %430 = shalt.err (!%p427_p1)
}
 0x1c6   :  { %346 = dma.vmem_to_hbm [thread:$0]  %s344_s27, 32, %s499_s2, [#allocation8]  }
 0x1c7   :  { %433 = dma.done.wait [#allocation8], 32  }
 0x1c8   :  { %434 = vsyncadd [#allocation8], 4294967264 }
 0x1c9   :  { %350 = vsyncpa [#allocation7], 1 }
 0x1ca   :  { %351 = vsyncpa [#allocation8], 1 }

</bundles_post_ra>
